<compile_context>
chip_gen: v5e
topology: v5e:2x2
jax: 0.10.0
libtpu: 0.0.40
codegen_flags: <defaults>
</compile_context>

<pallas_src>
import functools

import numpy as np
import jax
import jax.numpy as jnp
from jax.experimental import pallas as pl
from jax.experimental.pallas import tpu as pltpu


_ROW_TILE_PREFS = (1024, 512, 256, 128, 64, 32, 16, 8)   # sublane row tile
_K_TILE_PREFS = (2048, 1024, 512, 256, 128)              # lane/reduction tile
_VMEM_LIMIT = 48 * 1024 * 1024   # < v7x's 64 MiB/TC; lifts v5e's 16 MiB default


def _pick_tile(base, prefs):
    """Largest preferred tile that evenly divides `base` (fallback: base)."""
    for p in prefs:
        if p <= base and base % p == 0:
            return p
    return base


# ---------------------------------------------------------------------------
# Kernels
# ---------------------------------------------------------------------------
def _linear_kernel(x_ref, w_ref, o_ref):
    """O_tile = X_tile @ W  (bf16 MXU operands, f32 accumulation, bf16 store)."""
    x = x_ref[...].astype(w_ref.dtype)
    o_ref[...] = jnp.dot(x, w_ref[...],
                         preferred_element_type=jnp.float32).astype(o_ref.dtype)


def _agg_kernel(a_ref, xw_ref, inv_ref, b_ref, o_ref, *, relu):
    """One (row-tile, k-tile) step of  O = inv_deg * (A @ XW) + b  [+ReLU].

    The f32 output block is the accumulator (its block index is constant over
    the k axis so it stays resident in VMEM) - no scratch buffer needed.
    """
    k = pl.program_id(1)

    @pl.when(k == 0)
    def _init():
        o_ref[...] = jnp.zeros_like(o_ref)

    # bf16 x bf16 -> f32 accumulate: single-pass MXU matmul.
    o_ref[...] += jnp.dot(a_ref[...], xw_ref[...],
                          preferred_element_type=jnp.float32)

    @pl.when(k == pl.num_programs(1) - 1)
    def _finalize():
        y = o_ref[...] * inv_ref[...] + b_ref[...]
        if relu:
            y = jnp.maximum(y, 0.0)
        o_ref[...] = y


def _fused_out_kernel(alpha_ref, a_ref, xw3_ref, xw2s_ref, inv_ref, b2_ref,
                      b3_ref, o_ref, *, half_blocks):
    """out = alpha * x_1 + x_2 for one output row tile.

    x_1 = A_hyper @ XW2 + b2 == row shift of XW2 (one-to-one, deg=1) for node
          row tiles, and just b2 for hyperedge row tiles (zero in-degree).
    x_2 = inv_deg * (A_e2n @ XW3) + b3, accumulated over k tiles directly in
          the resident f32 output block.

    NOTE: grid indices are read only at kernel top level (never inside a
    pl.when body) so the kernel lowers cleanly in both Mosaic and interpret.
    """
    i = pl.program_id(0)
    k = pl.program_id(1)
    # 1.0 for node row tiles (first half of the grid rows), 0.0 for hyperedge
    # row tiles; a scalar multiplier avoids a vector select on a scalar bool.
    node_mask = (i < half_blocks).astype(jnp.float32)

    @pl.when(k == 0)
    def _init():
        o_ref[...] = jnp.zeros_like(o_ref)

    o_ref[...] += jnp.dot(a_ref[...], xw3_ref[...],
                          preferred_element_type=jnp.float32)

    @pl.when(k == pl.num_programs(1) - 1)
    def _finalize():
        x2 = o_ref[...] * inv_ref[...] + b3_ref[...]
        x1 = node_mask * xw2s_ref[...].astype(jnp.float32) + b2_ref[...]
        o_ref[...] = alpha_ref[0] * x1 + x2


def _x1_only_kernel(xw2s_ref, b2_ref, o_ref, *, half_blocks):
    """B_Broad=False path: x_1 = row-shift(XW2) + b2."""
    node_mask = (pl.program_id(0) < half_blocks).astype(jnp.float32)
    o_ref[...] = node_mask * xw2s_ref[...].astype(jnp.float32) + b2_ref[...]


# ---------------------------------------------------------------------------
# Wrappers (pallas_call)
# ---------------------------------------------------------------------------
def linear(x, w):
    """XW precompute: rows tiled, weight resident, bf16 output for the MXU."""
    n, f = x.shape
    d = w.shape[1]
    tm = _pick_tile(n, _ROW_TILE_PREFS)
    return pl.pallas_call(
        _linear_kernel,
        out_shape=jax.ShapeDtypeStruct((n, d), jnp.bfloat16),
        grid=(n // tm,),
        in_specs=[pl.BlockSpec((tm, f), lambda i: (i, 0)),
                  pl.BlockSpec((f, d), lambda i: (0, 0))],
        out_specs=pl.BlockSpec((tm, d), lambda i: (i, 0)),
        compiler_params=pltpu.CompilerParams(
            dimension_semantics=("parallel",),
            vmem_limit_bytes=_VMEM_LIMIT),
    )(x, w)


def hgae_aggregate(a01, xw, inv_deg, bias, *, nums, relu=False):
    """O = inv_deg * (A01 @ XW) + b  [+ReLU]; rows parallel, k arbitrary."""
    n = a01.shape[0]
    d = xw.shape[1]
    tm = _pick_tile(nums, _ROW_TILE_PREFS)   # <= nums -> >= 2 row tiles (v7x)
    tk = _pick_tile(n, _K_TILE_PREFS)
    kern = functools.partial(_agg_kernel, relu=relu)
    return pl.pallas_call(
        kern,
        out_shape=jax.ShapeDtypeStruct((n, d), jnp.float32),
        grid=(n // tm, n // tk),
        in_specs=[
            pl.BlockSpec((tm, tk), lambda i, k: (i, k)),   # A incidence (bf16)
            pl.BlockSpec((tk, d), lambda i, k: (k, 0)),    # XW (bf16), k-index
            pl.BlockSpec((tm, 1), lambda i, k: (i, 0)),    # 1/deg per row
            pl.BlockSpec((1, d), lambda i, k: (0, 0)),     # bias
        ],
        out_specs=pl.BlockSpec((tm, d), lambda i, k: (i, 0)),
        compiler_params=pltpu.CompilerParams(
            dimension_semantics=("parallel", "arbitrary"),
            vmem_limit_bytes=_VMEM_LIMIT),
    )(a01, xw, inv_deg, bias)


def hgae_fused_out(alpha, a_e2n, xw2, xw3, inv_deg, b2, b3, *, nums):
    """Fused conv2 + conv3 + combine: alpha*(shift(XW2)+b2) + inv*(A@XW3)+b3."""
    n = a_e2n.shape[0]
    d = xw3.shape[1]
    tm = _pick_tile(nums, _ROW_TILE_PREFS)
    tk = _pick_tile(n, _K_TILE_PREFS)
    ni, nk = n // tm, n // tk
    half = nums // tm
    kern = functools.partial(_fused_out_kernel, half_blocks=half)

    def xw2_map(i, k):
        # Node row tile i reads XW2 rows [nums + i*tm, ...).  Hyperedge row
        # tiles (i >= half) are clamped to a constant block so the pipeline
        # re-uses the already-resident buffer instead of issuing dead DMAs
        # (their contribution is masked to zero inside the kernel anyway).
        del k
        return (jnp.minimum(i, half - 1) + half, 0)

    return pl.pallas_call(
        kern,
        out_shape=jax.ShapeDtypeStruct((n, d), jnp.float32),
        grid=(ni, nk),
        in_specs=[
            pl.BlockSpec(memory_space=pltpu.MemorySpace.SMEM),  # alpha (1,)
            pl.BlockSpec((tm, tk), lambda i, k: (i, k)),        # A_e2n (bf16)
            pl.BlockSpec((tk, d), lambda i, k: (k, 0)),         # XW3 (bf16)
            pl.BlockSpec((tm, d), xw2_map),                     # shifted XW2
            pl.BlockSpec((tm, 1), lambda i, k: (i, 0)),         # 1/deg
            pl.BlockSpec((1, d), lambda i, k: (0, 0)),          # b2
            pl.BlockSpec((1, d), lambda i, k: (0, 0)),          # b3
        ],
        out_specs=pl.BlockSpec((tm, d), lambda i, k: (i, 0)),
        compiler_params=pltpu.CompilerParams(
            dimension_semantics=("parallel", "arbitrary"),
            vmem_limit_bytes=_VMEM_LIMIT),
    )(alpha, a_e2n, xw3, xw2, inv_deg, b2, b3)


def hgae_x1_only(xw2, b2, *, nums):
    n, d = xw2.shape
    tm = _pick_tile(nums, _ROW_TILE_PREFS)
    ni = n // tm
    half = nums // tm
    kern = functools.partial(_x1_only_kernel, half_blocks=half)

    def xw2_map(i):
        return (jnp.minimum(i, half - 1) + half, 0)

    return pl.pallas_call(
        kern,
        out_shape=jax.ShapeDtypeStruct((n, d), jnp.float32),
        grid=(ni,),
        in_specs=[pl.BlockSpec((tm, d), xw2_map),
                  pl.BlockSpec((1, d), lambda i: (0, 0))],
        out_specs=pl.BlockSpec((tm, d), lambda i: (i, 0)),
        compiler_params=pltpu.CompilerParams(
            dimension_semantics=("parallel",)),
    )(xw2, b2)


# ---------------------------------------------------------------------------
# Host-side prep (mirrors the PyTorch __init__) and the model
# ---------------------------------------------------------------------------
def _incidence_and_invdeg(edge_index, n):
    """bf16 incidence counts (exact small multiplicities) and 1/deg (f32)."""
    src, dst = np.asarray(edge_index[0]), np.asarray(edge_index[1])
    a = np.zeros((n, n), dtype=np.float32)
    np.add.at(a, (dst, src), 1.0)                 # counts multi-edges
    deg = a.sum(axis=1, keepdims=True)
    # zero-degree rows have an all-zero A row, so any finite 1/deg is fine
    inv = 1.0 / np.where(deg > 0.0, deg, 1.0)
    return jnp.asarray(a, jnp.bfloat16), jnp.asarray(inv, jnp.float32)


class DirectedHGAE:
    def __init__(self, fts, nums, edge_index, *, B_Aggre=True, B_Broad=True,
                 key=None):
        assert nums % 8 == 0, "nums must be a multiple of 8 for TPU tiling"
        in_feats = fts.shape[1]
        out_feats = 64
        self.nums = nums
        self.out_feats = out_feats
        self.B_Broad = B_Broad
        n_total = 2 * nums   # nodes [0, nums) + hyperedges [nums, 2*nums)

        # --- edge-index bookkeeping, identical to the torch __init__ ---
        edge_index_hypergraph = np.array(
            [[x for x in range(nums, 2 * nums)],
             [x for x in range(0, nums)]])
        edge_index_nodetoedge = np.array(edge_index).copy()
        edge_index_nodetoedge[1] = edge_index_nodetoedge[1] + nums
        if B_Aggre:
            e2e = edge_index_hypergraph.tolist()
            e2e[0], e2e[1] = e2e[1], e2e[0]
            edge_index_nodetoedge = np.concatenate(
                (edge_index_nodetoedge, np.array(e2e)), axis=1)
        e2n = edge_index_nodetoedge.tolist()
        e2n[0], e2n[1] = e2n[1], e2n[0]
        edge_index_edgetonode = np.array(e2n)

        # Incidence patterns (bf16, exact small counts) + per-row 1/deg.
        # A_hyper (hyperedge nums+i -> node i) is never materialized: it is a
        # row shift folded into the fused output kernel.
        self.a_n2e, self.inv_n2e = _incidence_and_invdeg(
            edge_index_nodetoedge, n_total)
        self.a_e2n, self.inv_e2n = _incidence_and_invdeg(
            edge_index_edgetonode, n_total)

        # --- parameters (deterministic init); weights stored bf16 for the MXU
        k1, k2, k3, kb1, kb2, kb3 = jax.random.split(key, 6)
        s_in = 1.0 / np.sqrt(in_feats)
        s_out = 1.0 / np.sqrt(out_feats)
        self.w1 = jax.random.uniform(k1, (in_feats, out_feats), jnp.float32,
                                     -s_in, s_in).astype(jnp.bfloat16)
        self.w2 = jax.random.uniform(k2, (out_feats, out_feats), jnp.float32,
                                     -s_out, s_out).astype(jnp.bfloat16)
        self.w3 = jax.random.uniform(k3, (out_feats, out_feats), jnp.float32,
                                     -s_out, s_out).astype(jnp.bfloat16)
        self.b1 = jax.random.uniform(kb1, (1, out_feats), jnp.float32,
                                     -s_in, s_in)
        self.b2 = jax.random.uniform(kb2, (1, out_feats), jnp.float32,
                                     -s_out, s_out)
        self.b3 = jax.random.uniform(kb3, (1, out_feats), jnp.float32,
                                     -s_out, s_out)
        self.alpha = jnp.array([1.0], jnp.float32)

        self.fts = jnp.asarray(fts, jnp.float32)

    def forward(self):
        # conv1: node -> hyperedge mean aggregation of fts @ W1, + b1, ReLU
        xw1 = linear(self.fts, self.w1)                               # (N,64) bf16
        x = hgae_aggregate(self.a_n2e, xw1, self.inv_n2e, self.b1,
                           nums=self.nums, relu=True)                 # (N,64) f32
        xw2 = linear(x, self.w2)                                      # (N,64) bf16
        if not self.B_Broad:
            return hgae_x1_only(xw2, self.b2, nums=self.nums)
        xw3 = linear(x, self.w3)                                      # (N,64) bf16
        # fused conv2 (row shift of XW2) + conv3 (A_e2n aggregation) + combine
        return hgae_fused_out(self.alpha, self.a_e2n, xw2, xw3,
                              self.inv_e2n, self.b2, self.b3, nums=self.nums)


# ---------------------------------------------------------------------------
# Pure-JAX reference (for numerical validation of the kernels)
# ---------------------------------------------------------------------------
def _reference_forward(model):
    hp = jax.lax.Precision.HIGHEST
    n = model.fts.shape[0]
    nums = model.nums
    a_n2e = model.a_n2e.astype(jnp.float32) * model.inv_n2e
    a_e2n = model.a_e2n.astype(jnp.float32) * model.inv_e2n
    w1 = model.w1.astype(jnp.float32)
    w2 = model.w2.astype(jnp.float32)
    w3 = model.w3.astype(jnp.float32)
    x = jnp.maximum(
        jnp.dot(a_n2e, jnp.dot(model.fts, w1, precision=hp), precision=hp)
        + model.b1, 0.0)
    rows = jnp.arange(nums)
    a_hyper = jnp.zeros((n, n), jnp.float32).at[rows, rows + nums].set(1.0)
    x1 = jnp.dot(a_hyper, jnp.dot(x, w2, precision=hp), precision=hp) + model.b2
    x2 = jnp.dot(a_e2n, jnp.dot(x, w3, precision=hp), precision=hp) + model.b3
    if model.B_Broad:
        return model.alpha[0] * x1 + x2
    return x1


# ---------------------------------------------------------------------------
if __name__ == "__main__":
    key = jax.random.PRNGKey(0)
    k_fts, k_params = jax.random.split(key)

    nums = 256        # number of nodes (== number of hyperedges)
    in_feats = 128    # input feature dim
    n_total = 2 * nums

    # node + hyperedge features, shape (2*nums, in_feats) = (512, 128)
    fts = jax.random.normal(k_fts, (n_total, in_feats), jnp.float32)

    # incidence: node i belongs to hyperedge i and hyperedge (i+1) % nums
    src = np.concatenate([np.arange(nums), np.arange(nums)])
    dst = np.concatenate([np.arange(nums), (np.arange(nums) + 1) % nums])
    edge_index = np.stack([src, dst], axis=0)

    model = DirectedHGAE(fts, nums, edge_index,
                         B_Aggre=True, B_Broad=True, key=k_params)
    out = jax.block_until_ready(model.forward())
    assert out.shape == (n_total, 64) and out.dtype == jnp.float32
    ref = jax.block_until_ready(_reference_forward(model))
    np.testing.assert_allclose(np.asarray(out), np.asarray(ref),
                               rtol=2e-2, atol=2e-2)

    # also exercise the B_Broad=False (x_1-only) path
    model_nb = DirectedHGAE(fts, nums, edge_index,
                            B_Aggre=True, B_Broad=False, key=k_params)
    out_nb = jax.block_until_ready(model_nb.forward())
    ref_nb = jax.block_until_ready(_reference_forward(model_nb))
    np.testing.assert_allclose(np.asarray(out_nb), np.asarray(ref_nb),
                               rtol=2e-2, atol=2e-2)

    print("KERNEL_OK")
</pallas_src>

<mosaic_0001>
module attributes {stable_mosaic.version = 11 : i64} {
  func.func @_linear_kernel(%arg0: i32, %arg1: memref<512x128xf32, #tpu.memory_space<vmem>>, %arg2: memref<128x64xbf16, #tpu.memory_space<vmem>>, %arg3: memref<512x64xbf16, #tpu.memory_space<vmem>>) attributes {dimension_semantics = [#tpu.dimension_semantics<parallel>], iteration_bounds = array<i64: 1>, scalar_prefetch = 0 : i64, scratch_operands = 0 : i64, tpu.core_type = #tpu.core_type<tc>, window_params = [{transform_indices = @transform_0, window_bounds = array<i64: 512, 128>}, {pipeline_mode = #tpu.pipeline_mode<synchronous>, transform_indices = @transform_1, window_bounds = array<i64: 128, 64>}, {transform_indices = @transform_2, window_bounds = array<i64: 512, 64>}]} {
    %c0 = arith.constant 0 : index
    %c0_0 = arith.constant 0 : index
    %0 = vector.load %arg1[%c0, %c0_0] : memref<512x128xf32, #tpu.memory_space<vmem>>, vector<512x128xf32>
    %1 = arith.truncf %0 : vector<512x128xf32> to vector<512x128xbf16>
    %c0_1 = arith.constant 0 : index
    %c0_2 = arith.constant 0 : index
    %2 = vector.load %arg2[%c0_1, %c0_2] : memref<128x64xbf16, #tpu.memory_space<vmem>>, vector<128x64xbf16>
    %cst = arith.constant dense<0.000000e+00> : vector<512x64xf32>
    %3 = tpu.matmul %1, %2, %cst {dimension_numbers = #tpu.dot_dimension_numbers<[1], [0], [0], [1], [0, 0, 1, 1], [], []>} : vector<512x128xbf16>, vector<128x64xbf16>, vector<512x64xf32> -> vector<512x64xf32>
    %4 = arith.truncf %3 : vector<512x64xf32> to vector<512x64xbf16>
    %c0_3 = arith.constant 0 : index
    %c0_4 = arith.constant 0 : index
    %5 = vector.load %arg3[%c0_3, %c0_4] : memref<512x64xbf16, #tpu.memory_space<vmem>>, vector<512x64xbf16>
    tpu.vector_store %arg3[%c0_3, %c0_4], %4 {strides = array<i32>} : memref<512x64xbf16, #tpu.memory_space<vmem>>, vector<512x64xbf16>,
    return
  }
  func.func @transform_0(%arg0: i32) -> (i32, i32) {
    %c0_i32 = arith.constant 0 : i32
    %c0_i32_0 = arith.constant 0 : i32
    return %arg0, %c0_i32 : i32, i32
  }
  func.func @transform_1(%arg0: i32) -> (i32, i32) {
    %c0_i32 = arith.constant 0 : i32
    %c0_i32_0 = arith.constant 0 : i32
    %c0_i32_1 = arith.constant 0 : i32
    return %c0_i32, %c0_i32_0 : i32, i32
  }
  func.func @transform_2(%arg0: i32) -> (i32, i32) {
    %c0_i32 = arith.constant 0 : i32
    %c0_i32_0 = arith.constant 0 : i32
    return %arg0, %c0_i32 : i32, i32
  }
}

</mosaic_0001>

<bundles_post_ra>
// kernel: tpu_custom_call.1
= control target key start
LH: loop header
LB: loop body
LE: loop exit
PB: predicated region body
PF: predicated region fallthrough
CT: control target
= control target key end

     0   :  { %7 = vsyncpa [#allocation3], 0  ;;  %s583_s12 = smov [#allocation2]   ;;  %s584_s14 = smov 128   ;;  %s884_s0 = inlined_call_operand.hbm [shape: f32[512,128], index: 0, kind: input, shape index: {}]   ;;  %s885_s1 = inlined_call_operand.vmem [shape: bf16[128,64], index: 1, kind: input, shape index: {}]   ;;  %s886_s2 = inlined_call_operand.vmem [shape: bf16[512,64], index: 2, kind: output, shape index: {}]  }
   0x1   :  { %s12_s11 = sshll.u32 %s884_s0, 4  ;;  %s14_s13 = sshll.u32 %s583_s12, 4  ;;  %s13_s11 = int_to_ptr.hbm [resolvable:$true] %s12_s11  ;;  %s15_s13 = int_to_ptr.vmem [resolvable:$true] %s14_s13 }
   0x2   :  { %s585_s15 = smov 8  }
   0x3   :  { %20 = dma.hbm_to_vmem [thread:$0]  %s13_s11, 8192, %s15_s13, [#allocation3], %s584_s14, %s584_s14, %s585_s15  }
   0x4   :  { %581 = dma.done.wait [#allocation3], 8192  }
   0x5   :  { %582 = vsyncadd [#allocation3], 4294959104  ;;  %v529_v0 = vld [vmem:[%s885_s1 + $0x38] sm:$0xff]  ;;  %v528_v1 = vld [vmem:[%s885_s1 + $0x30] sm:$0xff]  ;;  %vm420_vm0 = vcmask 519168  }
   0x6   :  { %187 = vmatpush.bf16.msra.mxu0 %v529_v0  ;;  %530 = vmatpush.bf16.msra.mxu1 %v529_v0  ;;  %v527_v2 = vld [vmem:[%s885_s1 + $0x28] sm:$0xff]  ;;  %v526_v3 = vld [vmem:[%s885_s1 + $0x20] sm:$0xff]  ;;  %v525_v4 = vld [vmem:[%s885_s1 + $0x18] sm:$0xff] }
   0x7   :  { %531 = vmatpush.bf16.msra.mxu2 %v529_v0  ;;  %532 = vmatpush.bf16.msra.mxu3 %v529_v0  ;;  %v524_v5 = vld [vmem:[%s885_s1 + $0x10] sm:$0xff]  ;;  %v523_v6 = vld [vmem:[%s885_s1 + $0x8] sm:$0xff]  ;;  %v522_v7 = vld [vmem:[%s885_s1] sm:$0xff] }
   0x8   :  { %v27_v8 = vld [vmem:[#allocation2] sm:$0xff]  ;;  %v28_v9 = vld [vmem:[#allocation2 + $0x8] sm:$0xff]  ;;  %v29_v20 = vld [vmem:[#allocation2 + $0x10] sm:$0xff] }
   0x9   :  { %v43_v10 = vld [vmem:[#allocation2 + $0x80] sm:$0xff]  ;;  %v44_v11 = vld [vmem:[#allocation2 + $0x88] sm:$0xff]  ;;  %v91_v16 = vpack.c.bf16 %v28_v9, %v27_v8  ;;  %v30_v21 = vld [vmem:[#allocation2 + $0x18] sm:$0xff] }
   0xa   :  { %188 = vmatpush.bf16.msra.mxu0 %v528_v1  ;;  %533 = vmatpush.bf16.msra.mxu1 %v528_v1  ;;  %v59_v12 = vld [vmem:[#allocation2 + $0x100] sm:$0xff]  ;;  %v60_v13 = vld [vmem:[#allocation2 + $0x108] sm:$0xff]  ;;  %v99_v17 = vpack.c.bf16 %v44_v11, %v43_v10  ;;  %v45_v22 = vld [vmem:[#allocation2 + $0x90] sm:$0xff]  ;;  %v92_v28 = vpack.c.bf16 %v30_v21, %v29_v20 }
   0xb   :  { %534 = vmatpush.bf16.msra.mxu2 %v528_v1  ;;  %535 = vmatpush.bf16.msra.mxu3 %v528_v1  ;;  %v75_v14 = vld [vmem:[#allocation2 + $0x180] sm:$0xff]  ;;  %v76_v15 = vld [vmem:[#allocation2 + $0x188] sm:$0xff]  ;;  %v107_v18 = vpack.c.bf16 %v60_v13, %v59_v12  ;;  %v46_v23 = vld [vmem:[#allocation2 + $0x98] sm:$0xff] }
   0xc   :  { %v115_v19 = vpack.c.bf16 %v76_v15, %v75_v14  ;;  %v61_v24 = vld [vmem:[#allocation2 + $0x110] sm:$0xff]  ;;  %v62_v25 = vld [vmem:[#allocation2 + $0x118] sm:$0xff]  ;;  %v100_v29 = vpack.c.bf16 %v46_v23, %v45_v22  ;;  %v31_v32 = vld [vmem:[#allocation2 + $0x20] sm:$0xff] }
   0xd   :  { %v77_v26 = vld [vmem:[#allocation2 + $0x190] sm:$0xff]  ;;  %v78_v27 = vld [vmem:[#allocation2 + $0x198] sm:$0xff]  ;;  %v108_v30 = vpack.c.bf16 %v62_v25, %v61_v24  ;;  %v32_v33 = vld [vmem:[#allocation2 + $0x28] sm:$0xff] }
   0xe   :  { %189 = vmatpush.bf16.msra.mxu0 %v527_v2  ;;  %536 = vmatpush.bf16.msra.mxu1 %v527_v2  ;;  %v116_v31 = vpack.c.bf16 %v78_v27, %v77_v26  ;;  %v47_v34 = vld [vmem:[#allocation2 + $0xa0] sm:$0xff]  ;;  %v48_v35 = vld [vmem:[#allocation2 + $0xa8] sm:$0xff]  ;;  %v93_v40 = vpack.c.bf16 %v32_v33, %v31_v32  ;;  %v33_v44 = vld [vmem:[#allocation2 + $0x30] sm:$0xff] }
   0xf   :  { %537 = vmatpush.bf16.msra.mxu2 %v527_v2  ;;  %538 = vmatpush.bf16.msra.mxu3 %v527_v2  ;;  %v63_v36 = vld [vmem:[#allocation2 + $0x120] sm:$0xff]  ;;  %v64_v37 = vld [vmem:[#allocation2 + $0x128] sm:$0xff]  ;;  %v101_v41 = vpack.c.bf16 %v48_v35, %v47_v34  ;;  %v34_v45 = vld [vmem:[#allocation2 + $0x38] sm:$0xff] }
  0x10   :  { %v79_v38 = vld [vmem:[#allocation2 + $0x1a0] sm:$0xff]  ;;  %v80_v39 = vld [vmem:[#allocation2 + $0x1a8] sm:$0xff]  ;;  %v109_v42 = vpack.c.bf16 %v64_v37, %v63_v36  ;;  %v49_v46 = vld [vmem:[#allocation2 + $0xb0] sm:$0xff]  ;;  %v94_v52 = vpack.c.bf16 %v34_v45, %v33_v44 }
  0x11   :  { %v117_v43 = vpack.c.bf16 %v80_v39, %v79_v38  ;;  %v50_v47 = vld [vmem:[#allocation2 + $0xb8] sm:$0xff]  ;;  %v65_v48 = vld [vmem:[#allocation2 + $0x130] sm:$0xff]  ;;  %v35_v56 = vld [vmem:[#allocation2 + $0x40] sm:$0xff] }
  0x12   :  { %190 = vmatpush.bf16.msra.mxu0 %v526_v3  ;;  %539 = vmatpush.bf16.msra.mxu1 %v526_v3  ;;  %v66_v49 = vld [vmem:[#allocation2 + $0x138] sm:$0xff]  ;;  %v81_v50 = vld [vmem:[#allocation2 + $0x1b0] sm:$0xff]  ;;  %v102_v53 = vpack.c.bf16 %v50_v47, %v49_v46  ;;  %v36_v57 = vld [vmem:[#allocation2 + $0x48] sm:$0xff] }
  0x13   :  { %540 = vmatpush.bf16.msra.mxu2 %v526_v3  ;;  %541 = vmatpush.bf16.msra.mxu3 %v526_v3  ;;  %v82_v51 = vld [vmem:[#allocation2 + $0x1b8] sm:$0xff]  ;;  %v110_v54 = vpack.c.bf16 %v66_v49, %v65_v48  ;;  %v51_v58 = vld [vmem:[#allocation2 + $0xc0] sm:$0xff]  ;;  %v52_v59 = vld [vmem:[#allocation2 + $0xc8] sm:$0xff]  ;;  %v95_v0 = vpack.c.bf16 %v36_v57, %v35_v56 }
  0x14   :  { %v118_v55 = vpack.c.bf16 %v82_v51, %v81_v50  ;;  %v67_v60 = vld [vmem:[#allocation2 + $0x140] sm:$0xff]  ;;  %v68_v61 = vld [vmem:[#allocation2 + $0x148] sm:$0xff]  ;;  %v103_v1 = vpack.c.bf16 %v52_v59, %v51_v58  ;;  %v69_v8 = vld [vmem:[#allocation2 + $0x150] sm:$0xff] }
  0x15   :  { %v83_v62 = vld [vmem:[#allocation2 + $0x1c0] sm:$0xff]  ;;  %v84_v63 = vld [vmem:[#allocation2 + $0x1c8] sm:$0xff]  ;;  %v111_v2 = vpack.c.bf16 %v68_v61, %v67_v60  ;;  %v70_v9 = vld [vmem:[#allocation2 + $0x158] sm:$0xff] }
  0x16   :  { %191 = vmatpush.bf16.msra.mxu0 %v525_v4  ;;  %542 = vmatpush.bf16.msra.mxu1 %v525_v4  ;;  %v119_v3 = vpack.c.bf16 %v84_v63, %v83_v62  ;;  %v85_v10 = vld [vmem:[#allocation2 + $0x1d0] sm:$0xff]  ;;  %v86_v11 = vld [vmem:[#allocation2 + $0x1d8] sm:$0xff]  ;;  %v112_v14 = vpack.c.bf16 %v70_v9, %v69_v8  ;;  %v71_v20 = vld [vmem:[#allocation2 + $0x160] sm:$0xff] }
  0x17   :  { %543 = vmatpush.bf16.msra.mxu2 %v525_v4  ;;  %544 = vmatpush.bf16.msra.mxu3 %v525_v4  ;;  %v37_v4 = vld [vmem:[#allocation2 + $0x50] sm:$0xff]  ;;  %v120_v15 = vpack.c.bf16 %v86_v11, %v85_v10  ;;  %v72_v21 = vld [vmem:[#allocation2 + $0x168] sm:$0xff]  ;;  %v87_v22 = vld [vmem:[#allocation2 + $0x1e0] sm:$0xff] }
  0x18   :  { %v88_v23 = vld [vmem:[#allocation2 + $0x1e8] sm:$0xff]  ;;  %v113_v26 = vpack.c.bf16 %v72_v21, %v71_v20  ;;  %v73_v32 = vld [vmem:[#allocation2 + $0x170] sm:$0xff]  ;;  %v74_v33 = vld [vmem:[#allocation2 + $0x178] sm:$0xff] }
  0x19   :  { %v121_v27 = vpack.c.bf16 %v88_v23, %v87_v22  ;;  %v89_v34 = vld [vmem:[#allocation2 + $0x1f0] sm:$0xff]  ;;  %v90_v35 = vld [vmem:[#allocation2 + $0x1f8] sm:$0xff]  ;;  %v114_v38 = vpack.c.bf16 %v74_v33, %v73_v32 }
  0x1a   :  { %192 = vmatpush.bf16.msra.mxu0 %v524_v5  ;;  %545 = vmatpush.bf16.msra.mxu1 %v524_v5  ;;  %v122_v39 = vpack.c.bf16 %v90_v35, %v89_v34 }
  0x1b   :  { %546 = vmatpush.bf16.msra.mxu2 %v524_v5  ;;  %547 = vmatpush.bf16.msra.mxu3 %v524_v5  ;;  %v38_v5 = vld [vmem:[#allocation2 + $0x58] sm:$0xff] }
  0x1c   :  { %v96_v12 = vpack.c.bf16 %v38_v5, %v37_v4 }
  0x1e   :  { %193 = vmatpush.bf16.msra.mxu0 %v523_v6  ;;  %548 = vmatpush.bf16.msra.mxu1 %v523_v6 }
  0x1f   :  { %549 = vmatpush.bf16.msra.mxu2 %v523_v6  ;;  %550 = vmatpush.bf16.msra.mxu3 %v523_v6  ;;  %v53_v6 = vld [vmem:[#allocation2 + $0xd0] sm:$0xff] }
  0x22   :  { %194 = vmatpush.bf16.msra.mxu0 %v522_v7  ;;  %551 = vmatpush.bf16.msra.mxu1 %v522_v7 }
  0x23   :  { %552 = vmatpush.bf16.msra.mxu2 %v522_v7  ;;  %553 = vmatpush.bf16.msra.mxu3 %v522_v7  ;;  %v54_v7 = vld [vmem:[#allocation2 + $0xd8] sm:$0xff] }
  0x24   :  { %v104_v13 = vpack.c.bf16 %v54_v7, %v53_v6 }
  0x25   :  { %195 = vmatmul.bf16.vlgmr.msra.gmra.mxu0 %v91_v16  ;;  %235 = vmatmul.bf16.vlgmr.msra.gmra.mxu1 %v99_v17  ;;  %v39_v16 = vld [vmem:[#allocation2 + $0x60] sm:$0xff]  ;;  %v40_v17 = vld [vmem:[#allocation2 + $0x68] sm:$0xff] }
  0x26   :  { %275 = vmatmul.bf16.vlgmr.msra.gmra.mxu2 %v107_v18  ;;  %315 = vmatmul.bf16.vlgmr.msra.gmra.mxu3 %v115_v19  ;;  %v55_v18 = vld [vmem:[#allocation2 + $0xe0] sm:$0xff]  ;;  %v56_v19 = vld [vmem:[#allocation2 + $0xe8] sm:$0xff]  ;;  %v97_v24 = vpack.c.bf16 %v40_v17, %v39_v16 }
  0x27   :  { %v105_v25 = vpack.c.bf16 %v56_v19, %v55_v18 }
  0x35   :  { %200 = vmatmul.bf16.gmra.mxu0 %v92_v28  ;;  %240 = vmatmul.bf16.gmra.mxu1 %v100_v29  ;;  %v41_v28 = vld [vmem:[#allocation2 + $0x70] sm:$0xff]  ;;  %v42_v29 = vld [vmem:[#allocation2 + $0x78] sm:$0xff] }
  0x36   :  { %280 = vmatmul.bf16.gmra.mxu2 %v108_v30  ;;  %320 = vmatmul.bf16.gmra.mxu3 %v116_v31  ;;  %v57_v30 = vld [vmem:[#allocation2 + $0xf0] sm:$0xff]  ;;  %v58_v31 = vld [vmem:[#allocation2 + $0xf8] sm:$0xff]  ;;  %v98_v36 = vpack.c.bf16 %v42_v29, %v41_v28 }
  0x37   :  { %v106_v37 = vpack.c.bf16 %v58_v31, %v57_v30 }
  0x45   :  { %205 = vmatmul.bf16.gmra.mxu0 %v93_v40  ;;  %245 = vmatmul.bf16.gmra.mxu1 %v101_v41 }
  0x46   :  { %285 = vmatmul.bf16.gmra.mxu2 %v109_v42  ;;  %325 = vmatmul.bf16.gmra.mxu3 %v117_v43 }
  0x55   :  { %210 = vmatmul.bf16.gmra.mxu0 %v94_v52  ;;  %250 = vmatmul.bf16.gmra.mxu1 %v102_v53 }
  0x56   :  { %290 = vmatmul.bf16.gmra.mxu2 %v110_v54  ;;  %330 = vmatmul.bf16.gmra.mxu3 %v118_v55 }
  0x65   :  { %215 = vmatmul.bf16.gmra.mxu0 %v95_v0  ;;  %255 = vmatmul.bf16.gmra.mxu1 %v103_v1 }
  0x66   :  { %295 = vmatmul.bf16.gmra.mxu2 %v111_v2  ;;  %335 = vmatmul.bf16.gmra.mxu3 %v119_v3 }
  0x75   :  { %220 = vmatmul.bf16.gmra.mxu0 %v96_v12  ;;  %260 = vmatmul.bf16.gmra.mxu1 %v104_v13 }
  0x76   :  { %300 = vmatmul.bf16.gmra.mxu2 %v112_v14  ;;  %340 = vmatmul.bf16.gmra.mxu3 %v120_v15 }
  0x85   :  { %225 = vmatmul.bf16.gmra.mxu0 %v97_v24  ;;  %265 = vmatmul.bf16.gmra.mxu1 %v105_v25 }
  0x86   :  { %305 = vmatmul.bf16.gmra.mxu2 %v113_v26  ;;  %345 = vmatmul.bf16.gmra.mxu3 %v121_v27 }
  0x95   :  { %230 = vmatmul.bf16.gmra.mxu0 %v98_v36  ;;  %270 = vmatmul.bf16.gmra.mxu1 %v106_v37 }
  0x96   :  { %310 = vmatmul.bf16.gmra.mxu2 %v114_v38  ;;  %350 = vmatmul.bf16.gmra.mxu3 %v122_v39 }
  0xa2   :  { %v196_v40 = vpop.f32.mrf.mxu0  ;;  %v236_v41 = vpop.f32.mrf.mxu1 }
  0xa3   :  { %v356_v42 = vpack.c.bf16 %v196_v40, %v196_v40  ;;  %v372_v43 = vpack.c.bf16 %v236_v41, %v236_v41 }
  0xa5   :  { %421 = vst.msk [vmem:[%s886_s2] sm:$0xf] %vm420_vm0, %v356_v42 }
  0xa6   :  { %437 = vst.msk [vmem:[%s886_s2 + $0x40] sm:$0xf] %vm420_vm0, %v372_v43 }
  0xa9   :  { %v276_v44 = vpop.f32.mrf.mxu2  ;;  %v316_v45 = vpop.f32.mrf.mxu3 }
  0xaa   :  { %v388_v46 = vpack.c.bf16 %v276_v44, %v276_v44  ;;  %v404_v47 = vpack.c.bf16 %v316_v45, %v316_v45  ;;  %v198_v48 = vpop.f32.mrf.mxu0  ;;  %v238_v49 = vpop.f32.mrf.mxu1 }
  0xab   :  { %v357_v50 = vpack.c.bf16 %v198_v48, %v198_v48  ;;  %v373_v51 = vpack.c.bf16 %v238_v49, %v238_v49 }
  0xac   :  { %453 = vst.msk [vmem:[%s886_s2 + $0x80] sm:$0xf] %vm420_vm0, %v388_v46 }
  0xad   :  { %469 = vst.msk [vmem:[%s886_s2 + $0xc0] sm:$0xf] %vm420_vm0, %v404_v47 }
  0xae   :  { %422 = vst.msk [vmem:[%s886_s2 + $0x4] sm:$0xf] %vm420_vm0, %v357_v50 }
  0xaf   :  { %438 = vst.msk [vmem:[%s886_s2 + $0x44] sm:$0xf] %vm420_vm0, %v373_v51 }
  0xb1   :  { %v278_v52 = vpop.f32.mrf.mxu2  ;;  %v318_v53 = vpop.f32.mrf.mxu3 }
  0xb2   :  { %v389_v54 = vpack.c.bf16 %v278_v52, %v278_v52  ;;  %v405_v55 = vpack.c.bf16 %v318_v53, %v318_v53  ;;  %v201_v56 = vpop.f32.mrf.mxu0  ;;  %v241_v57 = vpop.f32.mrf.mxu1 }
  0xb3   :  { %v358_v58 = vpack.c.bf16 %v201_v56, %v201_v56  ;;  %v374_v59 = vpack.c.bf16 %v241_v57, %v241_v57 }
  0xb4   :  { %454 = vst.msk [vmem:[%s886_s2 + $0x84] sm:$0xf] %vm420_vm0, %v389_v54 }
  0xb5   :  { %470 = vst.msk [vmem:[%s886_s2 + $0xc4] sm:$0xf] %vm420_vm0, %v405_v55 }
  0xb6   :  { %423 = vst.msk [vmem:[%s886_s2 + $0x8] sm:$0xf] %vm420_vm0, %v358_v58 }
  0xb7   :  { %439 = vst.msk [vmem:[%s886_s2 + $0x48] sm:$0xf] %vm420_vm0, %v374_v59 }
  0xb9   :  { %v281_v60 = vpop.f32.mrf.mxu2  ;;  %v321_v61 = vpop.f32.mrf.mxu3 }
  0xba   :  { %v390_v62 = vpack.c.bf16 %v281_v60, %v281_v60  ;;  %v406_v63 = vpack.c.bf16 %v321_v61, %v321_v61  ;;  %v203_v0 = vpop.f32.mrf.mxu0  ;;  %v243_v1 = vpop.f32.mrf.mxu1 }
  0xbb   :  { %v359_v2 = vpack.c.bf16 %v203_v0, %v203_v0  ;;  %v375_v3 = vpack.c.bf16 %v243_v1, %v243_v1 }
  0xbc   :  { %455 = vst.msk [vmem:[%s886_s2 + $0x88] sm:$0xf] %vm420_vm0, %v390_v62 }
  0xbd   :  { %471 = vst.msk [vmem:[%s886_s2 + $0xc8] sm:$0xf] %vm420_vm0, %v406_v63 }
  0xbe   :  { %424 = vst.msk [vmem:[%s886_s2 + $0xc] sm:$0xf] %vm420_vm0, %v359_v2 }
  0xbf   :  { %440 = vst.msk [vmem:[%s886_s2 + $0x4c] sm:$0xf] %vm420_vm0, %v375_v3 }
  0xc1   :  { %v283_v4 = vpop.f32.mrf.mxu2  ;;  %v323_v5 = vpop.f32.mrf.mxu3 }
  0xc2   :  { %v391_v6 = vpack.c.bf16 %v283_v4, %v283_v4  ;;  %v407_v7 = vpack.c.bf16 %v323_v5, %v323_v5  ;;  %v206_v8 = vpop.f32.mrf.mxu0  ;;  %v246_v9 = vpop.f32.mrf.mxu1 }
  0xc3   :  { %v360_v10 = vpack.c.bf16 %v206_v8, %v206_v8  ;;  %v376_v11 = vpack.c.bf16 %v246_v9, %v246_v9 }
  0xc4   :  { %456 = vst.msk [vmem:[%s886_s2 + $0x8c] sm:$0xf] %vm420_vm0, %v391_v6 }
  0xc5   :  { %472 = vst.msk [vmem:[%s886_s2 + $0xcc] sm:$0xf] %vm420_vm0, %v407_v7 }
  0xc6   :  { %425 = vst.msk [vmem:[%s886_s2 + $0x10] sm:$0xf] %vm420_vm0, %v360_v10 }
  0xc7   :  { %441 = vst.msk [vmem:[%s886_s2 + $0x50] sm:$0xf] %vm420_vm0, %v376_v11 }
  0xc9   :  { %v286_v12 = vpop.f32.mrf.mxu2  ;;  %v326_v13 = vpop.f32.mrf.mxu3 }
  0xca   :  { %v392_v14 = vpack.c.bf16 %v286_v12, %v286_v12  ;;  %v408_v15 = vpack.c.bf16 %v326_v13, %v326_v13  ;;  %v208_v16 = vpop.f32.mrf.mxu0  ;;  %v248_v17 = vpop.f32.mrf.mxu1 }
  0xcb   :  { %v361_v18 = vpack.c.bf16 %v208_v16, %v208_v16  ;;  %v377_v19 = vpack.c.bf16 %v248_v17, %v248_v17 }
  0xcc   :  { %457 = vst.msk [vmem:[%s886_s2 + $0x90] sm:$0xf] %vm420_vm0, %v392_v14 }
  0xcd   :  { %473 = vst.msk [vmem:[%s886_s2 + $0xd0] sm:$0xf] %vm420_vm0, %v408_v15 }
  0xce   :  { %426 = vst.msk [vmem:[%s886_s2 + $0x14] sm:$0xf] %vm420_vm0, %v361_v18 }
  0xcf   :  { %442 = vst.msk [vmem:[%s886_s2 + $0x54] sm:$0xf] %vm420_vm0, %v377_v19 }
  0xd1   :  { %v288_v20 = vpop.f32.mrf.mxu2  ;;  %v328_v21 = vpop.f32.mrf.mxu3 }
  0xd2   :  { %v393_v22 = vpack.c.bf16 %v288_v20, %v288_v20  ;;  %v409_v23 = vpack.c.bf16 %v328_v21, %v328_v21  ;;  %v211_v24 = vpop.f32.mrf.mxu0  ;;  %v251_v25 = vpop.f32.mrf.mxu1 }
  0xd3   :  { %v362_v26 = vpack.c.bf16 %v211_v24, %v211_v24  ;;  %v378_v27 = vpack.c.bf16 %v251_v25, %v251_v25 }
  0xd4   :  { %458 = vst.msk [vmem:[%s886_s2 + $0x94] sm:$0xf] %vm420_vm0, %v393_v22 }
  0xd5   :  { %474 = vst.msk [vmem:[%s886_s2 + $0xd4] sm:$0xf] %vm420_vm0, %v409_v23 }
  0xd6   :  { %427 = vst.msk [vmem:[%s886_s2 + $0x18] sm:$0xf] %vm420_vm0, %v362_v26 }
  0xd7   :  { %443 = vst.msk [vmem:[%s886_s2 + $0x58] sm:$0xf] %vm420_vm0, %v378_v27 }
  0xd9   :  { %v291_v28 = vpop.f32.mrf.mxu2  ;;  %v331_v29 = vpop.f32.mrf.mxu3 }
  0xda   :  { %v394_v30 = vpack.c.bf16 %v291_v28, %v291_v28  ;;  %v410_v31 = vpack.c.bf16 %v331_v29, %v331_v29  ;;  %v213_v32 = vpop.f32.mrf.mxu0  ;;  %v253_v33 = vpop.f32.mrf.mxu1 }
  0xdb   :  { %v363_v34 = vpack.c.bf16 %v213_v32, %v213_v32  ;;  %v379_v35 = vpack.c.bf16 %v253_v33, %v253_v33 }
  0xdc   :  { %459 = vst.msk [vmem:[%s886_s2 + $0x98] sm:$0xf] %vm420_vm0, %v394_v30 }
  0xdd   :  { %475 = vst.msk [vmem:[%s886_s2 + $0xd8] sm:$0xf] %vm420_vm0, %v410_v31 }
  0xde   :  { %428 = vst.msk [vmem:[%s886_s2 + $0x1c] sm:$0xf] %vm420_vm0, %v363_v34 }
  0xdf   :  { %444 = vst.msk [vmem:[%s886_s2 + $0x5c] sm:$0xf] %vm420_vm0, %v379_v35 }
  0xe1   :  { %v293_v36 = vpop.f32.mrf.mxu2  ;;  %v333_v37 = vpop.f32.mrf.mxu3 }
  0xe2   :  { %v395_v38 = vpack.c.bf16 %v293_v36, %v293_v36  ;;  %v411_v39 = vpack.c.bf16 %v333_v37, %v333_v37  ;;  %v216_v40 = vpop.f32.mrf.mxu0  ;;  %v256_v41 = vpop.f32.mrf.mxu1 }
  0xe3   :  { %v364_v42 = vpack.c.bf16 %v216_v40, %v216_v40  ;;  %v380_v43 = vpack.c.bf16 %v256_v41, %v256_v41 }
  0xe4   :  { %460 = vst.msk [vmem:[%s886_s2 + $0x9c] sm:$0xf] %vm420_vm0, %v395_v38 }
  0xe5   :  { %476 = vst.msk [vmem:[%s886_s2 + $0xdc] sm:$0xf] %vm420_vm0, %v411_v39 }
  0xe6   :  { %429 = vst.msk [vmem:[%s886_s2 + $0x20] sm:$0xf] %vm420_vm0, %v364_v42 }
  0xe7   :  { %445 = vst.msk [vmem:[%s886_s2 + $0x60] sm:$0xf] %vm420_vm0, %v380_v43 }
  0xe9   :  { %v296_v44 = vpop.f32.mrf.mxu2  ;;  %v336_v45 = vpop.f32.mrf.mxu3 }
  0xea   :  { %v396_v46 = vpack.c.bf16 %v296_v44, %v296_v44  ;;  %v412_v47 = vpack.c.bf16 %v336_v45, %v336_v45  ;;  %v218_v48 = vpop.f32.mrf.mxu0  ;;  %v258_v49 = vpop.f32.mrf.mxu1 }
  0xeb   :  { %v365_v50 = vpack.c.bf16 %v218_v48, %v218_v48  ;;  %v381_v51 = vpack.c.bf16 %v258_v49, %v258_v49 }
  0xec   :  { %461 = vst.msk [vmem:[%s886_s2 + $0xa0] sm:$0xf] %vm420_vm0, %v396_v46 }
  0xed   :  { %477 = vst.msk [vmem:[%s886_s2 + $0xe0] sm:$0xf] %vm420_vm0, %v412_v47 }
  0xee   :  { %430 = vst.msk [vmem:[%s886_s2 + $0x24] sm:$0xf] %vm420_vm0, %v365_v50 }
  0xef   :  { %446 = vst.msk [vmem:[%s886_s2 + $0x64] sm:$0xf] %vm420_vm0, %v381_v51 }
  0xf1   :  { %v298_v52 = vpop.f32.mrf.mxu2  ;;  %v338_v53 = vpop.f32.mrf.mxu3 }
  0xf2   :  { %v397_v54 = vpack.c.bf16 %v298_v52, %v298_v52  ;;  %v413_v55 = vpack.c.bf16 %v338_v53, %v338_v53  ;;  %v221_v56 = vpop.f32.mrf.mxu0  ;;  %v261_v57 = vpop.f32.mrf.mxu1 }
  0xf3   :  { %v366_v58 = vpack.c.bf16 %v221_v56, %v221_v56  ;;  %v382_v59 = vpack.c.bf16 %v261_v57, %v261_v57 }
  0xf4   :  { %462 = vst.msk [vmem:[%s886_s2 + $0xa4] sm:$0xf] %vm420_vm0, %v397_v54 }
  0xf5   :  { %478 = vst.msk [vmem:[%s886_s2 + $0xe4] sm:$0xf] %vm420_vm0, %v413_v55 }
  0xf6   :  { %431 = vst.msk [vmem:[%s886_s2 + $0x28] sm:$0xf] %vm420_vm0, %v366_v58 }
  0xf7   :  { %447 = vst.msk [vmem:[%s886_s2 + $0x68] sm:$0xf] %vm420_vm0, %v382_v59 }
  0xf9   :  { %v301_v60 = vpop.f32.mrf.mxu2  ;;  %v341_v61 = vpop.f32.mrf.mxu3 }
  0xfa   :  { %v398_v62 = vpack.c.bf16 %v301_v60, %v301_v60  ;;  %v414_v63 = vpack.c.bf16 %v341_v61, %v341_v61  ;;  %v223_v0 = vpop.f32.mrf.mxu0  ;;  %v263_v1 = vpop.f32.mrf.mxu1 }
  0xfb   :  { %v367_v2 = vpack.c.bf16 %v223_v0, %v223_v0  ;;  %v383_v3 = vpack.c.bf16 %v263_v1, %v263_v1 }
  0xfc   :  { %463 = vst.msk [vmem:[%s886_s2 + $0xa8] sm:$0xf] %vm420_vm0, %v398_v62 }
  0xfd   :  { %479 = vst.msk [vmem:[%s886_s2 + $0xe8] sm:$0xf] %vm420_vm0, %v414_v63 }
  0xfe   :  { %432 = vst.msk [vmem:[%s886_s2 + $0x2c] sm:$0xf] %vm420_vm0, %v367_v2 }
  0xff   :  { %448 = vst.msk [vmem:[%s886_s2 + $0x6c] sm:$0xf] %vm420_vm0, %v383_v3 }
 0x101   :  { %v303_v4 = vpop.f32.mrf.mxu2  ;;  %v343_v5 = vpop.f32.mrf.mxu3 }
 0x102   :  { %v399_v6 = vpack.c.bf16 %v303_v4, %v303_v4  ;;  %v415_v7 = vpack.c.bf16 %v343_v5, %v343_v5  ;;  %v226_v8 = vpop.f32.mrf.mxu0  ;;  %v266_v9 = vpop.f32.mrf.mxu1 }
 0x103   :  { %v368_v10 = vpack.c.bf16 %v226_v8, %v226_v8  ;;  %v384_v11 = vpack.c.bf16 %v266_v9, %v266_v9 }
 0x104   :  { %464 = vst.msk [vmem:[%s886_s2 + $0xac] sm:$0xf] %vm420_vm0, %v399_v6 }
 0x105   :  { %480 = vst.msk [vmem:[%s886_s2 + $0xec] sm:$0xf] %vm420_vm0, %v415_v7 }
 0x106   :  { %433 = vst.msk [vmem:[%s886_s2 + $0x30] sm:$0xf] %vm420_vm0, %v368_v10 }
 0x107   :  { %449 = vst.msk [vmem:[%s886_s2 + $0x70] sm:$0xf] %vm420_vm0, %v384_v11 }
 0x109   :  { %v306_v12 = vpop.f32.mrf.mxu2  ;;  %v346_v13 = vpop.f32.mrf.mxu3 }
 0x10a   :  { %v400_v14 = vpack.c.bf16 %v306_v12, %v306_v12  ;;  %v416_v15 = vpack.c.bf16 %v346_v13, %v346_v13  ;;  %v228_v16 = vpop.f32.mrf.mxu0  ;;  %v268_v17 = vpop.f32.mrf.mxu1 }
 0x10b   :  { %v369_v18 = vpack.c.bf16 %v228_v16, %v228_v16  ;;  %v385_v19 = vpack.c.bf16 %v268_v17, %v268_v17 }
 0x10c   :  { %465 = vst.msk [vmem:[%s886_s2 + $0xb0] sm:$0xf] %vm420_vm0, %v400_v14 }
 0x10d   :  { %481 = vst.msk [vmem:[%s886_s2 + $0xf0] sm:$0xf] %vm420_vm0, %v416_v15 }
 0x10e   :  { %434 = vst.msk [vmem:[%s886_s2 + $0x34] sm:$0xf] %vm420_vm0, %v369_v18 }
 0x10f   :  { %450 = vst.msk [vmem:[%s886_s2 + $0x74] sm:$0xf] %vm420_vm0, %v385_v19 }
 0x111   :  { %v308_v20 = vpop.f32.mrf.mxu2  ;;  %v348_v21 = vpop.f32.mrf.mxu3 }
 0x112   :  { %v401_v22 = vpack.c.bf16 %v308_v20, %v308_v20  ;;  %v417_v23 = vpack.c.bf16 %v348_v21, %v348_v21  ;;  %v231_v24 = vpop.f32.mrf.mxu0  ;;  %v271_v25 = vpop.f32.mrf.mxu1 }
 0x113   :  { %v370_v26 = vpack.c.bf16 %v231_v24, %v231_v24  ;;  %v386_v27 = vpack.c.bf16 %v271_v25, %v271_v25 }
 0x114   :  { %466 = vst.msk [vmem:[%s886_s2 + $0xb4] sm:$0xf] %vm420_vm0, %v401_v22 }
 0x115   :  { %482 = vst.msk [vmem:[%s886_s2 + $0xf4] sm:$0xf] %vm420_vm0, %v417_v23 }
 0x116   :  { %435 = vst.msk [vmem:[%s886_s2 + $0x38] sm:$0xf] %vm420_vm0, %v370_v26 }
 0x117   :  { %451 = vst.msk [vmem:[%s886_s2 + $0x78] sm:$0xf] %vm420_vm0, %v386_v27 }
 0x119   :  { %v311_v28 = vpop.f32.mrf.mxu2  ;;  %v351_v29 = vpop.f32.mrf.mxu3 }
 0x11a   :  { %v402_v30 = vpack.c.bf16 %v311_v28, %v311_v28  ;;  %v418_v31 = vpack.c.bf16 %v351_v29, %v351_v29  ;;  %v233_v32 = vpop.f32.mrf.mxu0  ;;  %v273_v33 = vpop.f32.mrf.mxu1 }
 0x11b   :  { %v371_v34 = vpack.c.bf16 %v233_v32, %v233_v32  ;;  %v387_v35 = vpack.c.bf16 %v273_v33, %v273_v33 }
 0x11c   :  { %467 = vst.msk [vmem:[%s886_s2 + $0xb8] sm:$0xf] %vm420_vm0, %v402_v30 }
 0x11d   :  { %483 = vst.msk [vmem:[%s886_s2 + $0xf8] sm:$0xf] %vm420_vm0, %v418_v31 }
 0x11e   :  { %436 = vst.msk [vmem:[%s886_s2 + $0x3c] sm:$0xf] %vm420_vm0, %v371_v34 }
 0x11f   :  { %452 = vst.msk [vmem:[%s886_s2 + $0x7c] sm:$0xf] %vm420_vm0, %v387_v35 }
 0x121   :  { %v313_v36 = vpop.f32.mrf.mxu2  ;;  %v353_v37 = vpop.f32.mrf.mxu3 }
 0x122   :  { %v403_v38 = vpack.c.bf16 %v313_v36, %v313_v36  ;;  %v419_v39 = vpack.c.bf16 %v353_v37, %v353_v37 }
 0x124   :  { %468 = vst.msk [vmem:[%s886_s2 + $0xbc] sm:$0xf] %vm420_vm0, %v403_v38 }
 0x125   :  { %484 = vst.msk [vmem:[%s886_s2 + $0xfc] sm:$0xf] %vm420_vm0, %v419_v39 }
 0x126   :  { %489 = vsyncpa [#allocation3], 1 }

</bundles_post_ra>
